<compile_context>
chip_gen: v6e
topology: v6e:2x2x1
jax: 0.10.0
libtpu: 0.0.40
codegen_flags: <defaults>
</compile_context>

<pallas_src>
import functools

import jax
import jax.numpy as jnp
from jax.experimental import pallas as pl
from jax.experimental.pallas import tpu as pltpu


HIDDEN = 10  # n_h_nodes[0] == n_h_nodes[1] == 10 in the PyTorch module


def _policy_mlp_kernel(x_ref, p_ref, o_ref, *, d_in, hidden, d_out):
    # Packed parameter layout (single VMEM block, one DMA):
    #   rows [0, d_in)                   : w1  [d_in, hidden]   in cols [0, hidden)
    #   row  d_in                        : b1  [hidden]
    #   rows [d_in+1, d_in+1+hidden)     : w3  [hidden, d_out]  in cols [0, d_out)
    #   row  d_in+1+hidden               : b3  [d_out]
    p = p_ref[...]
    w1 = p[0:d_in, 0:hidden]
    b1 = p[d_in:d_in + 1, 0:hidden]
    w3 = p[d_in + 1:d_in + 1 + hidden, 0:d_out]
    b3 = p[d_in + 1 + hidden:d_in + 2 + hidden, 0:d_out]

    x = x_ref[...]
    h = jnp.dot(x, w1, preferred_element_type=jnp.float32) + b1
    h = jnp.maximum(h, 0.0)  # relu
    out = jnp.dot(h, w3, preferred_element_type=jnp.float32) + b3
    o_ref[...] = out.astype(o_ref.dtype)


def pack_policy_params(w1, b1, w3, b3):
    """Pack (w1, b1, w3, b3) into a single kernel-ready [rows_pad, 128] f32 block.

    Done once at init; the per-call wrapper does no reshaping/packing.
    w1: [d_in, hidden], b1: [hidden], w3: [hidden, d_out], b3: [d_out].
    """
    d_in, hidden = w1.shape
    d_out = w3.shape[1]
    assert hidden <= 128 and d_out <= 128, "packed layout assumes <=128 lanes"
    rows = d_in + hidden + 2
    rows_pad = ((rows + 7) // 8) * 8  # sublane-align
    p = jnp.zeros((rows_pad, 128), jnp.float32)
    p = p.at[0:d_in, 0:hidden].set(w1.astype(jnp.float32))
    p = p.at[d_in, 0:hidden].set(b1.astype(jnp.float32))
    p = p.at[d_in + 1:d_in + 1 + hidden, 0:d_out].set(w3.astype(jnp.float32))
    p = p.at[d_in + 1 + hidden, 0:d_out].set(b3.astype(jnp.float32))
    return p


def policy_network_forward(x, packed_params, *, d_in, hidden, d_out, tile_b=512):
    """x: [B, d_in] f32; packed_params: output of pack_policy_params."""
    B = x.shape[0]
    tile_b = min(tile_b, B)
    grid = (pl.cdiv(B, tile_b),)

    kernel = functools.partial(
        _policy_mlp_kernel, d_in=d_in, hidden=hidden, d_out=d_out)

    flops = 2 * B * (d_in * hidden + hidden * d_out)
    bytes_accessed = 4 * (B * d_in + int(packed_params.size) + B * d_out)

    return pl.pallas_call(
        kernel,
        out_shape=jax.ShapeDtypeStruct((B, d_out), jnp.float32),
        grid=grid,
        in_specs=[
            # x: tiled along batch.
            pl.BlockSpec((tile_b, d_in), lambda i: (i, 0)),
            # packed params: one grid-invariant full-extent block -> single DMA.
            pl.BlockSpec(packed_params.shape, lambda i: (0, 0)),
        ],
        out_specs=pl.BlockSpec((tile_b, d_out), lambda i: (i, 0)),
        compiler_params=pltpu.CompilerParams(
            dimension_semantics=("parallel",)),
        cost_estimate=pl.CostEstimate(
            flops=flops, transcendentals=0, bytes_accessed=bytes_accessed),
    )(x, packed_params)


def init_policy_network_params(key, input_dim, output_dim):
    """Mimics nn.Linear's uniform(-1/sqrt(fan_in), 1/sqrt(fan_in)) init,
    then fc3.weight *= 0.1 and fc3.bias *= 0.0 as in the PyTorch __init__.
    Weights are stored pre-transposed as [in_features, out_features]."""
    hidden = HIDDEN
    k1, k2, k3, k4 = jax.random.split(key, 4)

    bound1 = 1.0 / (input_dim ** 0.5)
    w1 = jax.random.uniform(k1, (input_dim, hidden), jnp.float32, -bound1, bound1)
    b1 = jax.random.uniform(k2, (hidden,), jnp.float32, -bound1, bound1)

    bound3 = 1.0 / (hidden ** 0.5)
    w3 = jax.random.uniform(k3, (hidden, output_dim), jnp.float32, -bound3, bound3) * 0.1
    b3 = jax.random.uniform(k4, (output_dim,), jnp.float32, -bound3, bound3) * 0.0

    # fc2 is defined in __init__ but never used in forward(); skipped here.
    return w1, b1, w3, b3


if __name__ == "__main__":
    key = jax.random.PRNGKey(0)
    kx, kp, kbig = jax.random.split(key, 3)

    batch = 8
    input_dim = 6
    output_dim = 4

    w1, b1, w3, b3 = init_policy_network_params(kp, input_dim, output_dim)
    packed = pack_policy_params(w1, b1, w3, b3)  # one-time packing at init

    forward = jax.jit(functools.partial(
        policy_network_forward,
        d_in=input_dim, hidden=HIDDEN, d_out=output_dim, tile_b=512))

    # --- small-batch check (single grid step) ---
    x = jax.random.normal(kx, (batch, input_dim), dtype=jnp.float32)
    out = jax.block_until_ready(forward(x, packed))
    ref = jnp.maximum(x @ w1 + b1, 0.0) @ w3 + b3
    assert out.shape == (batch, output_dim)
    assert jnp.allclose(out, ref, atol=1e-5, rtol=1e-5)

    # --- larger-batch check (exercises the batch grid / parallel axis) ---
    forward_big = jax.jit(functools.partial(
        policy_network_forward,
        d_in=input_dim, hidden=HIDDEN, d_out=output_dim, tile_b=256))
    x_big = jax.random.normal(kbig, (1024, input_dim), dtype=jnp.float32)
    out_big = jax.block_until_ready(forward_big(x_big, packed))
    ref_big = jnp.maximum(x_big @ w1 + b1, 0.0) @ w3 + b3
    assert out_big.shape == (1024, output_dim)
    assert jnp.allclose(out_big, ref_big, atol=1e-5, rtol=1e-5)

    print("KERNEL_OK")
</pallas_src>

<mosaic_0001>
module attributes {stable_mosaic.version = 11 : i64} {
  func.func @_policy_mlp_kernel(%arg0: i32, %arg1: memref<8x6xf32, #tpu.memory_space<vmem>>, %arg2: memref<24x128xf32, #tpu.memory_space<vmem>>, %arg3: memref<8x4xf32, #tpu.memory_space<vmem>>) attributes {dimension_semantics = [#tpu.dimension_semantics<parallel>], iteration_bounds = array<i64: 1>, scalar_prefetch = 0 : i64, scratch_operands = 0 : i64, tpu.core_type = #tpu.core_type<tc>, window_params = [{transform_indices = @transform_0, window_bounds = array<i64: 8, 6>}, {pipeline_mode = #tpu.pipeline_mode<synchronous>, transform_indices = @transform_1, window_bounds = array<i64: 24, 128>}, {transform_indices = @transform_2, window_bounds = array<i64: 8, 4>}]} {
    %c0 = arith.constant 0 : index
    %c0_0 = arith.constant 0 : index
    %0 = vector.load %arg2[%c0, %c0_0] : memref<24x128xf32, #tpu.memory_space<vmem>>, vector<24x128xf32>
    %1 = vector.extract_strided_slice %0 {offsets = [0, 0], sizes = [6, 10], strides = [1, 1]} : vector<24x128xf32> to vector<6x10xf32>
    %2 = vector.extract_strided_slice %0 {offsets = [6, 0], sizes = [1, 10], strides = [1, 1]} : vector<24x128xf32> to vector<1x10xf32>
    %3 = vector.extract_strided_slice %0 {offsets = [7, 0], sizes = [10, 4], strides = [1, 1]} : vector<24x128xf32> to vector<10x4xf32>
    %4 = vector.extract_strided_slice %0 {offsets = [17, 0], sizes = [1, 4], strides = [1, 1]} : vector<24x128xf32> to vector<1x4xf32>
    %c0_1 = arith.constant 0 : index
    %c0_2 = arith.constant 0 : index
    %5 = vector.load %arg1[%c0_1, %c0_2] : memref<8x6xf32, #tpu.memory_space<vmem>>, vector<8x6xf32>
    %cst = arith.constant dense<0.000000e+00> : vector<8x10xf32>
    %6 = tpu.matmul %5, %1, %cst {dimension_numbers = #tpu.dot_dimension_numbers<[1], [0], [0], [1], [0, 0, 1, 1], [], []>} : vector<8x6xf32>, vector<6x10xf32>, vector<8x10xf32> -> vector<8x10xf32>
    %7 = vector.broadcast %2 : vector<1x10xf32> to vector<8x10xf32>
    %8 = arith.addf %6, %7 : vector<8x10xf32>
    %cst_3 = arith.constant 0.000000e+00 : f32
    %9 = vector.broadcast %cst_3 : f32 to vector<8x10xf32>
    %10 = arith.maximumf %8, %9 : vector<8x10xf32>
    %cst_4 = arith.constant dense<0.000000e+00> : vector<8x4xf32>
    %11 = tpu.matmul %10, %3, %cst_4 {dimension_numbers = #tpu.dot_dimension_numbers<[1], [0], [0], [1], [0, 0, 1, 1], [], []>} : vector<8x10xf32>, vector<10x4xf32>, vector<8x4xf32> -> vector<8x4xf32>
    %12 = vector.broadcast %4 : vector<1x4xf32> to vector<8x4xf32>
    %13 = arith.addf %11, %12 : vector<8x4xf32>
    %c0_5 = arith.constant 0 : index
    %c0_6 = arith.constant 0 : index
    %14 = vector.load %arg3[%c0_5, %c0_6] : memref<8x4xf32, #tpu.memory_space<vmem>>, vector<8x4xf32>
    tpu.vector_store %arg3[%c0_5, %c0_6], %13 {strides = array<i32>} : memref<8x4xf32, #tpu.memory_space<vmem>>, vector<8x4xf32>,
    return
  }
  func.func @transform_0(%arg0: i32) -> (i32, i32) {
    %c0_i32 = arith.constant 0 : i32
    %c0_i32_0 = arith.constant 0 : i32
    return %arg0, %c0_i32 : i32, i32
  }
  func.func @transform_1(%arg0: i32) -> (i32, i32) {
    %c0_i32 = arith.constant 0 : i32
    %c0_i32_0 = arith.constant 0 : i32
    %c0_i32_1 = arith.constant 0 : i32
    return %c0_i32, %c0_i32_0 : i32, i32
  }
  func.func @transform_2(%arg0: i32) -> (i32, i32) {
    %c0_i32 = arith.constant 0 : i32
    %c0_i32_0 = arith.constant 0 : i32
    return %arg0, %c0_i32 : i32, i32
  }
}

</mosaic_0001>

<bundles_post_ra>
// kernel: policy_network_forward.1
= control target key start
LH: loop header
LB: loop body
LE: loop exit
PB: predicated region body
PF: predicated region fallthrough
CT: control target
= control target key end

     0   :  { %7 = vsyncpa [#allocation3], 0  ;;  %s323_s0 = inlined_call_operand.hbm [shape: f32[8,6], index: 0, kind: input, shape index: {}]   ;;  %s324_s1 = inlined_call_operand.hbm [shape: f32[24,128], index: 1, kind: input, shape index: {}]   ;;  %s325_s2 = inlined_call_operand.vmem [shape: f32[8,4], index: 2, kind: output, shape index: {}]  }
   0x1   :  { %8 = vsyncpa [#allocation5], 0  ;;  %s293_s9 = smov [#allocation2]   ;;  %s294_s11 = smov [#allocation4]  }
   0x2   :  { %s15_s10 = sshll.u32 %s293_s9, 4  ;;  %s24_s12 = sshll.u32 %s294_s11, 4  ;;  %s16_s10 = int_to_ptr.vmem [resolvable:$true] %s15_s10  ;;  %s25_s12 = int_to_ptr.vmem [resolvable:$true] %s24_s12 }
   0x3   :  { %s257_s13 = scalar_lea.vmem %s16_s10, 128  ;;  %p262_p1 = scmp.lt.s32.totalorder %s16_s10, %s16_s10 }
   0x4   :  { %p258_p0 = scmp.ne.s32.totalorder %s16_s10, %s257_s13  ;;  %p263_p2 = scmp.lt.s32.totalorder %s257_s13, %s257_s13 }
   0x6   :  { %p264_p3 = por %p263_p2, %p262_p1 }
   0x8   :  { %p265_p4 = pnand %p264_p3, %p258_p0 }
   0xa   :  { %268 = shalt.err (!%p265_p4)
}
   0xb   :  { %18 = dma.hbm_to_vmem [thread:$0]  %s323_s0, 128, %s16_s10, [#allocation3]  }
   0xc   :  { %s277_s16 = scalar_lea.vmem %s25_s12, 384  ;;  %p282_p6 = scmp.lt.s32.totalorder %s25_s12, %s25_s12 }
   0xd   :  { %p278_p5 = scmp.ne.s32.totalorder %s25_s12, %s277_s16  ;;  %p283_p7 = scmp.lt.s32.totalorder %s277_s16, %s277_s16 }
   0xf   :  { %p284_p8 = por %p283_p7, %p282_p6 }
  0x11   :  { %p285_p9 = pnand %p284_p8, %p278_p5 }
  0x13   :  { %288 = shalt.err (!%p285_p9)
}
  0x14   :  { %s295_s17 = smov 128   ;;  %s296_s18 = smov 8  }
  0x15   :  { %30 = dma.hbm_to_vmem [thread:$0]  %s324_s1, 384, %s25_s12, [#allocation5], %s295_s17, %s295_s17, %s296_s18  }
  0x16   :  { %289 = dma.done.wait [#allocation3], 128  }
  0x17   :  { %290 = vsyncadd [#allocation3], 4294967168 }
  0x18   :  { %291 = dma.done.wait [#allocation5], 384  }
  0x19   :  { %292 = vsyncadd [#allocation5], 4294966912  ;;  %v297_v0 = vmov 0.0   ;;  %vm298_vm0 = vmmov 0   ;;  %vm49_vm1 = vcmask 1045504   ;;  %vm45_vm2 = vcmask 48128  }
  0x1a   :  { %231 = vmatprep.subr.mxu0 %v297_v0  ;;  %233 = vmatprep.mubr.msk.f32.mxu0 %vm298_vm0, %v297_v0  ;;  %v37_v1 = vld [vmem:[#allocation4] sm:$0xff]  ;;  %v40_v2 = vld [vmem:[#allocation2] sm:$0xff]  ;;  %v38_v3 = vld [vmem:[#allocation4 + $0x8] sm:$0xff]  ;;  %vm130_vm3 = vcmask 1040384   ;;  %vm141_vm4 = vcmask 1041408   ;;  %v41_v10 = vlaneseq  ;;  %vm137_vm5 = vcmask 80896  }
  0x1b   :  { %236 = vmatprep.subr.mxu1 %v297_v0  ;;  %240 = vmatprep.mubr.msk.f32.mxu1 %vm298_vm0, %v297_v0  ;;  %v39_v4 = vld [vmem:[#allocation4 + $0x10] sm:$0xff]  ;;  %v131_v5 = vrot.slane %v37_v1, 7  ;;  %v132_v6 = vrot.slane %v38_v3, 7  ;;  %vm214_vm6 = vcmask 31744  }
  0x1c   :  { %232 = vmatpush3.msk.msra.mxu0 %vm49_vm1, %v37_v1  ;;  %v134_v7 = vrot.slane %v39_v4, 7  ;;  %v42_v11 = vshrl.u32 %v41_v10, 7 }
  0x1d   :  { %234 = vmatmul.mubr.msk.f32.vlgmr.msra.gmra.mxu0 %vm45_vm2, %v40_v2  ;;  %v133_v9 = vsel %vm130_vm3, %v131_v5, %v132_v6 }
  0x1e   :  { %v135_v8 = vsel %vm130_vm3, %v132_v6, %v134_v7  ;;  %v43_v12 = vsub.s32 6, %v42_v11  ;;  %v126_v18 = vsub.s32 1, %v42_v11 }
  0x1f   :  { %237 = vmatpush3.msk.msra.mxu1 %vm141_vm4, %v135_v8 }
  0x20   :  { %238 = vmatprep.subr.mxu1 %v297_v0  ;;  %v44_v13 = vrot.slane %v37_v1, %v43_v12  ;;  %v127_v19 = vrot.slane %v39_v4, %v126_v18 }
  0x21   :  { %239 = vmatpush3.msra.mxu1 %v133_v9 }
  0xdd   :  { %v119_v14 = vpop.f32.mrf.mxu0 }
  0xde   :  { %v120_v15 = vadd.f32 %v119_v14, %v44_v13 }
  0xdf   :  { %v235_v16 = vpop.f32.mrf.mxu0 }
  0xe0   :  { %v123_v17 = vmax.f32 %v120_v15, 0.0 }
  0xe2   :  { %241 = vmatmul.mubr.msk.f32.vlgmr.msra.gmra.mxu1 %vm137_vm5, %v123_v17 }
 0x1a2   :  { %v210_v20 = vpop.f32.mrf.mxu1 }
 0x1a3   :  { %v211_v21 = vadd.f32 %v210_v20, %v127_v19 }
 0x1a4   :  { %v242_v22 = vpop.f32.mrf.mxu1 }
 0x1a5   :  { %215 = vst.msk [vmem:[%s325_s2] sm:$0xff] %vm214_vm6, %v211_v21 }
 0x1a6   :  { %220 = vsyncpa [#allocation3], 1 }
 0x1a7   :  { %221 = vsyncpa [#allocation5], 1 }

</bundles_post_ra>
